<compile_context>
chip_gen: v6e
topology: v6e:2x2x1
jax: 0.10.0
libtpu: 0.0.40
codegen_flags: <defaults>
</compile_context>

<pallas_src>
import jax
import jax.numpy as jnp
from jax.experimental import pallas as pl
from jax.experimental.pallas import tpu as pltpu

NEG_SLOPE = 0.01  # nn.LeakyReLU default
LANE = 128        # lane width; feature dims are padded to a multiple of this


def _round_up(n, m):
    return ((n + m - 1) // m) * m


def _leaky_relu(x):
    return jnp.where(x > 0, x, NEG_SLOPE * x)


def mlp_kernel(x_ref,
               w1_ref, b1_ref,
               w2_ref, b2_ref,
               w3_ref, b3_ref,
               w4_ref, b4_ref,
               wl_ref, bl_ref,
               o_ref):
    # x tile and weights are bf16 -> bf16 x bf16 MXU matmuls with f32 accumulate.
    # Bias-add / LeakyReLU run in f32 on the already-f32 accumulator.
    h = jnp.dot(x_ref[...], w1_ref[...], preferred_element_type=jnp.float32) + b1_ref[...]
    h = _leaky_relu(h).astype(jnp.bfloat16)
    h = jnp.dot(h, w2_ref[...], preferred_element_type=jnp.float32) + b2_ref[...]
    h = _leaky_relu(h).astype(jnp.bfloat16)
    h = jnp.dot(h, w3_ref[...], preferred_element_type=jnp.float32) + b3_ref[...]
    h = _leaky_relu(h).astype(jnp.bfloat16)
    h = jnp.dot(h, w4_ref[...], preferred_element_type=jnp.float32) + b4_ref[...]
    # NOTE: the 4th hidden Linear has no activation in the reference module.
    h = h.astype(jnp.bfloat16)
    logits = jnp.dot(h, wl_ref[...], preferred_element_type=jnp.float32) + bl_ref[...]
    # Lane-dense (multiple-of-128) store; real classes are sliced off in the wrapper.
    o_ref[...] = logits.astype(o_ref.dtype)
    # NOTE: if TILE_B * hidden_pad grows large and bundle dumps show spills,
    # stage `h` through a reused pltpu.VMEM scratch instead of relying on regalloc.


def mlp_forward(x, params, *, tile_b=256):
    """x: [B, in_dim] f32; params: f32 weights [in, out] (transposed vs torch) + biases [1, out]."""
    (w1, b1, w2, b2, w3, b3, w4, b4, wl, bl) = params
    B, in_dim = x.shape
    hid_dim = w1.shape[1]
    out_dim = wl.shape[1]

    # Lane-dense padded dims.
    in_pad = _round_up(in_dim, LANE)
    hid_pad = _round_up(hid_dim, LANE)
    out_pad = _round_up(out_dim, LANE)

    # Batch tile: multiple of 8 (sublane), capped at tile_b.
    tb = min(tile_b, _round_up(B, 8))
    b_pad = _round_up(B, tb)

    bf16 = jnp.bfloat16
    xp = jnp.zeros((b_pad, in_pad), bf16).at[:B, :in_dim].set(x.astype(bf16))

    def pad_w(w, r, c):
        return jnp.zeros((r, c), bf16).at[:w.shape[0], :w.shape[1]].set(w.astype(bf16))

    def pad_b(b, c):
        return jnp.zeros((1, c), jnp.float32).at[:, :b.shape[1]].set(b.astype(jnp.float32))

    w1p, b1p = pad_w(w1, in_pad, hid_pad), pad_b(b1, hid_pad)
    w2p, b2p = pad_w(w2, hid_pad, hid_pad), pad_b(b2, hid_pad)
    w3p, b3p = pad_w(w3, hid_pad, hid_pad), pad_b(b3, hid_pad)
    w4p, b4p = pad_w(w4, hid_pad, hid_pad), pad_b(b4, hid_pad)
    wlp, blp = pad_w(wl, hid_pad, out_pad), pad_b(bl, out_pad)

    grid = (b_pad // tb,)

    # Resident-weight specs: index_map always (0, 0) -> weight DMA issued once.
    def resident(shape):
        return pl.BlockSpec(shape, lambda i: (0, 0))

    in_specs = [
        pl.BlockSpec((tb, in_pad), lambda i: (i, 0)),     # streamed activations
        resident((in_pad, hid_pad)), resident((1, hid_pad)),
        resident((hid_pad, hid_pad)), resident((1, hid_pad)),
        resident((hid_pad, hid_pad)), resident((1, hid_pad)),
        resident((hid_pad, hid_pad)), resident((1, hid_pad)),
        resident((hid_pad, out_pad)), resident((1, out_pad)),
    ]
    out_specs = pl.BlockSpec((tb, out_pad), lambda i: (i, 0))

    # VMEM budget (bytes): resident weights/biases + double-buffered x/out tiles
    # + live f32 intermediates, with 2x headroom; clamped to [32 MiB, 64 MiB]
    # so a v6e-sized config still fits v7x's 64 MiB physical VMEM.
    w_bytes = 2 * (in_pad * hid_pad + 3 * hid_pad * hid_pad + hid_pad * out_pad)
    b_bytes = 4 * (4 * hid_pad + out_pad)
    io_bytes = 2 * (tb * in_pad * 2) + 2 * (tb * out_pad * 4)
    inter_bytes = 3 * tb * hid_pad * 4
    vmem_limit = max(32 * 1024 * 1024,
                     min(2 * (w_bytes + b_bytes + io_bytes + inter_bytes),
                         64 * 1024 * 1024))

    cost = pl.CostEstimate(
        flops=2 * b_pad * (in_pad * hid_pad + 3 * hid_pad * hid_pad + hid_pad * out_pad),
        transcendentals=0,
        bytes_accessed=int(w_bytes + b_bytes + b_pad * in_pad * 2 + b_pad * out_pad * 4),
    )

    out_padded = pl.pallas_call(
        mlp_kernel,
        out_shape=jax.ShapeDtypeStruct((b_pad, out_pad), jnp.float32),
        grid=grid,
        in_specs=in_specs,
        out_specs=out_specs,
        compiler_params=pltpu.CompilerParams(
            dimension_semantics=("parallel",),
            vmem_limit_bytes=vmem_limit,
        ),
        cost_estimate=cost,
    )(xp, w1p, b1p, w2p, b2p, w3p, b3p, w4p, b4p, wlp, blp)

    return out_padded[:B, :out_dim]


def init_params(key, in_dim, hidden_dim, num_classes):
    """Mimic PyTorch nn.Linear default init: U(-1/sqrt(fan_in), 1/sqrt(fan_in))."""
    out_logits = num_classes if num_classes > 2 else 1
    dims = [(in_dim, hidden_dim),
            (hidden_dim, hidden_dim),
            (hidden_dim, hidden_dim),
            (hidden_dim, hidden_dim),
            (hidden_dim, out_logits)]
    params = []
    for (fan_in, fan_out) in dims:
        key, kw, kb = jax.random.split(key, 3)
        bound = 1.0 / (fan_in ** 0.5)
        w = jax.random.uniform(kw, (fan_in, fan_out), jnp.float32, -bound, bound)
        b = jax.random.uniform(kb, (1, fan_out), jnp.float32, -bound, bound)
        params += [w, b]
    return tuple(params)


def mlp_reference(x, params, *, bf16=True):
    """Pure-JAX reference. bf16=True mirrors the kernel's bf16 operand casts."""
    (w1, b1, w2, b2, w3, b3, w4, b4, wl, bl) = params
    if bf16:
        cast = lambda a: a.astype(jnp.bfloat16).astype(jnp.float32)
    else:
        cast = lambda a: a
    h = cast(x)
    for (w, b, act) in ((w1, b1, True), (w2, b2, True), (w3, b3, True), (w4, b4, False)):
        h = jnp.dot(h, cast(w), preferred_element_type=jnp.float32) + b
        if act:
            h = _leaky_relu(h)
        h = cast(h)
    return jnp.dot(h, cast(wl), preferred_element_type=jnp.float32) + bl


if __name__ == "__main__":
    B, in_dim, hidden_dim, num_classes = 8, 32, 32, 4

    key = jax.random.PRNGKey(0)
    key, kx = jax.random.split(key)
    x = jax.random.normal(kx, (B, in_dim), dtype=jnp.float32)
    params = init_params(key, in_dim, hidden_dim, num_classes)

    out = jax.jit(mlp_forward)(x, params)
    out = jax.block_until_ready(out)

    ref_bf16 = mlp_reference(x, params, bf16=True)   # same bf16 operand casts as kernel
    ref_f32 = mlp_reference(x, params, bf16=False)   # full-precision module semantics

    assert out.shape == (B, num_classes), out.shape
    assert jnp.allclose(out, ref_bf16, atol=1e-3, rtol=1e-3), \
        f"max err vs bf16 ref: {jnp.max(jnp.abs(out - ref_bf16))}"
    assert jnp.allclose(out, ref_f32, atol=5e-2, rtol=5e-2), \
        f"max err vs f32 ref: {jnp.max(jnp.abs(out - ref_f32))}"

    print("KERNEL_OK")
</pallas_src>

<mosaic_0001>
module attributes {stable_mosaic.version = 11 : i64} {
  func.func @mlp_kernel(%arg0: i32, %arg1: memref<8x128xbf16, #tpu.memory_space<vmem>>, %arg2: memref<128x128xbf16, #tpu.memory_space<vmem>>, %arg3: memref<1x128xf32, #tpu.memory_space<vmem>>, %arg4: memref<128x128xbf16, #tpu.memory_space<vmem>>, %arg5: memref<1x128xf32, #tpu.memory_space<vmem>>, %arg6: memref<128x128xbf16, #tpu.memory_space<vmem>>, %arg7: memref<1x128xf32, #tpu.memory_space<vmem>>, %arg8: memref<128x128xbf16, #tpu.memory_space<vmem>>, %arg9: memref<1x128xf32, #tpu.memory_space<vmem>>, %arg10: memref<128x128xbf16, #tpu.memory_space<vmem>>, %arg11: memref<1x128xf32, #tpu.memory_space<vmem>>, %arg12: memref<8x128xf32, #tpu.memory_space<vmem>>) attributes {dimension_semantics = [#tpu.dimension_semantics<parallel>], iteration_bounds = array<i64: 1>, scalar_prefetch = 0 : i64, scratch_operands = 0 : i64, tpu.core_type = #tpu.core_type<tc>, window_params = [{transform_indices = @transform_0, window_bounds = array<i64: 8, 128>}, {pipeline_mode = #tpu.pipeline_mode<synchronous>, transform_indices = @transform_1, window_bounds = array<i64: 128, 128>}, {pipeline_mode = #tpu.pipeline_mode<synchronous>, transform_indices = @transform_2, window_bounds = array<i64: 1, 128>}, {pipeline_mode = #tpu.pipeline_mode<synchronous>, transform_indices = @transform_3, window_bounds = array<i64: 128, 128>}, {pipeline_mode = #tpu.pipeline_mode<synchronous>, transform_indices = @transform_4, window_bounds = array<i64: 1, 128>}, {pipeline_mode = #tpu.pipeline_mode<synchronous>, transform_indices = @transform_5, window_bounds = array<i64: 128, 128>}, {pipeline_mode = #tpu.pipeline_mode<synchronous>, transform_indices = @transform_6, window_bounds = array<i64: 1, 128>}, {pipeline_mode = #tpu.pipeline_mode<synchronous>, transform_indices = @transform_7, window_bounds = array<i64: 128, 128>}, {pipeline_mode = #tpu.pipeline_mode<synchronous>, transform_indices = @transform_8, window_bounds = array<i64: 1, 128>}, {pipeline_mode = #tpu.pipeline_mode<synchronous>, transform_indices = @transform_9, window_bounds = array<i64: 128, 128>}, {pipeline_mode = #tpu.pipeline_mode<synchronous>, transform_indices = @transform_10, window_bounds = array<i64: 1, 128>}, {transform_indices = @transform_11, window_bounds = array<i64: 8, 128>}]} {
    %c0 = arith.constant 0 : index
    %c0_0 = arith.constant 0 : index
    %0 = vector.load %arg1[%c0, %c0_0] : memref<8x128xbf16, #tpu.memory_space<vmem>>, vector<8x128xbf16>
    %c0_1 = arith.constant 0 : index
    %c0_2 = arith.constant 0 : index
    %1 = vector.load %arg2[%c0_1, %c0_2] : memref<128x128xbf16, #tpu.memory_space<vmem>>, vector<128x128xbf16>
    %cst = arith.constant dense<0.000000e+00> : vector<8x128xf32>
    %2 = tpu.matmul %0, %1, %cst {dimension_numbers = #tpu.dot_dimension_numbers<[1], [0], [0], [1], [0, 0, 1, 1], [], []>} : vector<8x128xbf16>, vector<128x128xbf16>, vector<8x128xf32> -> vector<8x128xf32>
    %c0_3 = arith.constant 0 : index
    %c0_4 = arith.constant 0 : index
    %3 = vector.load %arg3[%c0_3, %c0_4] : memref<1x128xf32, #tpu.memory_space<vmem>>, vector<1x128xf32>
    %4 = vector.broadcast %3 : vector<1x128xf32> to vector<8x128xf32>
    %5 = arith.addf %2, %4 : vector<8x128xf32>
    %cst_5 = arith.constant 0.000000e+00 : f32
    %6 = vector.broadcast %cst_5 : f32 to vector<8x128xf32>
    %7 = arith.cmpf ogt, %5, %6 : vector<8x128xf32>
    %cst_6 = arith.constant 0.00999999977 : f32
    %8 = vector.broadcast %cst_6 : f32 to vector<8x128xf32>
    %9 = arith.mulf %8, %5 : vector<8x128xf32>
    %10 = arith.select %7, %5, %9 : vector<8x128xi1>, vector<8x128xf32>
    %11 = arith.truncf %10 : vector<8x128xf32> to vector<8x128xbf16>
    %c0_7 = arith.constant 0 : index
    %c0_8 = arith.constant 0 : index
    %12 = vector.load %arg4[%c0_7, %c0_8] : memref<128x128xbf16, #tpu.memory_space<vmem>>, vector<128x128xbf16>
    %cst_9 = arith.constant dense<0.000000e+00> : vector<8x128xf32>
    %13 = tpu.matmul %11, %12, %cst_9 {dimension_numbers = #tpu.dot_dimension_numbers<[1], [0], [0], [1], [0, 0, 1, 1], [], []>} : vector<8x128xbf16>, vector<128x128xbf16>, vector<8x128xf32> -> vector<8x128xf32>
    %c0_10 = arith.constant 0 : index
    %c0_11 = arith.constant 0 : index
    %14 = vector.load %arg5[%c0_10, %c0_11] : memref<1x128xf32, #tpu.memory_space<vmem>>, vector<1x128xf32>
    %15 = vector.broadcast %14 : vector<1x128xf32> to vector<8x128xf32>
    %16 = arith.addf %13, %15 : vector<8x128xf32>
    %cst_12 = arith.constant 0.000000e+00 : f32
    %17 = vector.broadcast %cst_12 : f32 to vector<8x128xf32>
    %18 = arith.cmpf ogt, %16, %17 : vector<8x128xf32>
    %cst_13 = arith.constant 0.00999999977 : f32
    %19 = vector.broadcast %cst_13 : f32 to vector<8x128xf32>
    %20 = arith.mulf %19, %16 : vector<8x128xf32>
    %21 = arith.select %18, %16, %20 : vector<8x128xi1>, vector<8x128xf32>
    %22 = arith.truncf %21 : vector<8x128xf32> to vector<8x128xbf16>
    %c0_14 = arith.constant 0 : index
    %c0_15 = arith.constant 0 : index
    %23 = vector.load %arg6[%c0_14, %c0_15] : memref<128x128xbf16, #tpu.memory_space<vmem>>, vector<128x128xbf16>
    %cst_16 = arith.constant dense<0.000000e+00> : vector<8x128xf32>
    %24 = tpu.matmul %22, %23, %cst_16 {dimension_numbers = #tpu.dot_dimension_numbers<[1], [0], [0], [1], [0, 0, 1, 1], [], []>} : vector<8x128xbf16>, vector<128x128xbf16>, vector<8x128xf32> -> vector<8x128xf32>
    %c0_17 = arith.constant 0 : index
    %c0_18 = arith.constant 0 : index
    %25 = vector.load %arg7[%c0_17, %c0_18] : memref<1x128xf32, #tpu.memory_space<vmem>>, vector<1x128xf32>
    %26 = vector.broadcast %25 : vector<1x128xf32> to vector<8x128xf32>
    %27 = arith.addf %24, %26 : vector<8x128xf32>
    %cst_19 = arith.constant 0.000000e+00 : f32
    %28 = vector.broadcast %cst_19 : f32 to vector<8x128xf32>
    %29 = arith.cmpf ogt, %27, %28 : vector<8x128xf32>
    %cst_20 = arith.constant 0.00999999977 : f32
    %30 = vector.broadcast %cst_20 : f32 to vector<8x128xf32>
    %31 = arith.mulf %30, %27 : vector<8x128xf32>
    %32 = arith.select %29, %27, %31 : vector<8x128xi1>, vector<8x128xf32>
    %33 = arith.truncf %32 : vector<8x128xf32> to vector<8x128xbf16>
    %c0_21 = arith.constant 0 : index
    %c0_22 = arith.constant 0 : index
    %34 = vector.load %arg8[%c0_21, %c0_22] : memref<128x128xbf16, #tpu.memory_space<vmem>>, vector<128x128xbf16>
    %cst_23 = arith.constant dense<0.000000e+00> : vector<8x128xf32>
    %35 = tpu.matmul %33, %34, %cst_23 {dimension_numbers = #tpu.dot_dimension_numbers<[1], [0], [0], [1], [0, 0, 1, 1], [], []>} : vector<8x128xbf16>, vector<128x128xbf16>, vector<8x128xf32> -> vector<8x128xf32>
    %c0_24 = arith.constant 0 : index
    %c0_25 = arith.constant 0 : index
    %36 = vector.load %arg9[%c0_24, %c0_25] : memref<1x128xf32, #tpu.memory_space<vmem>>, vector<1x128xf32>
    %37 = vector.broadcast %36 : vector<1x128xf32> to vector<8x128xf32>
    %38 = arith.addf %35, %37 : vector<8x128xf32>
    %39 = arith.truncf %38 : vector<8x128xf32> to vector<8x128xbf16>
    %c0_26 = arith.constant 0 : index
    %c0_27 = arith.constant 0 : index
    %40 = vector.load %arg10[%c0_26, %c0_27] : memref<128x128xbf16, #tpu.memory_space<vmem>>, vector<128x128xbf16>
    %cst_28 = arith.constant dense<0.000000e+00> : vector<8x128xf32>
    %41 = tpu.matmul %39, %40, %cst_28 {dimension_numbers = #tpu.dot_dimension_numbers<[1], [0], [0], [1], [0, 0, 1, 1], [], []>} : vector<8x128xbf16>, vector<128x128xbf16>, vector<8x128xf32> -> vector<8x128xf32>
    %c0_29 = arith.constant 0 : index
    %c0_30 = arith.constant 0 : index
    %42 = vector.load %arg11[%c0_29, %c0_30] : memref<1x128xf32, #tpu.memory_space<vmem>>, vector<1x128xf32>
    %43 = vector.broadcast %42 : vector<1x128xf32> to vector<8x128xf32>
    %44 = arith.addf %41, %43 : vector<8x128xf32>
    %c0_31 = arith.constant 0 : index
    %c0_32 = arith.constant 0 : index
    %45 = vector.load %arg12[%c0_31, %c0_32] : memref<8x128xf32, #tpu.memory_space<vmem>>, vector<8x128xf32>
    tpu.vector_store %arg12[%c0_31, %c0_32], %44 {strides = array<i32>} : memref<8x128xf32, #tpu.memory_space<vmem>>, vector<8x128xf32>,
    return
  }
  func.func @transform_0(%arg0: i32) -> (i32, i32) {
    %c0_i32 = arith.constant 0 : i32
    %c0_i32_0 = arith.constant 0 : i32
    return %arg0, %c0_i32 : i32, i32
  }
  func.func @transform_1(%arg0: i32) -> (i32, i32) {
    %c0_i32 = arith.constant 0 : i32
    %c0_i32_0 = arith.constant 0 : i32
    %c0_i32_1 = arith.constant 0 : i32
    return %c0_i32, %c0_i32_0 : i32, i32
  }
  func.func @transform_2(%arg0: i32) -> (i32, i32) {
    %c0_i32 = arith.constant 0 : i32
    %c0_i32_0 = arith.constant 0 : i32
    %c0_i32_1 = arith.constant 0 : i32
    return %c0_i32, %c0_i32_0 : i32, i32
  }
  func.func @transform_3(%arg0: i32) -> (i32, i32) {
    %c0_i32 = arith.constant 0 : i32
    %c0_i32_0 = arith.constant 0 : i32
    %c0_i32_1 = arith.constant 0 : i32
    return %c0_i32, %c0_i32_0 : i32, i32
  }
  func.func @transform_4(%arg0: i32) -> (i32, i32) {
    %c0_i32 = arith.constant 0 : i32
    %c0_i32_0 = arith.constant 0 : i32
    %c0_i32_1 = arith.constant 0 : i32
    return %c0_i32, %c0_i32_0 : i32, i32
  }
  func.func @transform_5(%arg0: i32) -> (i32, i32) {
    %c0_i32 = arith.constant 0 : i32
    %c0_i32_0 = arith.constant 0 : i32
    %c0_i32_1 = arith.constant 0 : i32
    return %c0_i32, %c0_i32_0 : i32, i32
  }
  func.func @transform_6(%arg0: i32) -> (i32, i32) {
    %c0_i32 = arith.constant 0 : i32
    %c0_i32_0 = arith.constant 0 : i32
    %c0_i32_1 = arith.constant 0 : i32
    return %c0_i32, %c0_i32_0 : i32, i32
  }
  func.func @transform_7(%arg0: i32) -> (i32, i32) {
    %c0_i32 = arith.constant 0 : i32
    %c0_i32_0 = arith.constant 0 : i32
    %c0_i32_1 = arith.constant 0 : i32
    return %c0_i32, %c0_i32_0 : i32, i32
  }
  func.func @transform_8(%arg0: i32) -> (i32, i32) {
    %c0_i32 = arith.constant 0 : i32
    %c0_i32_0 = arith.constant 0 : i32
    %c0_i32_1 = arith.constant 0 : i32
    return %c0_i32, %c0_i32_0 : i32, i32
  }
  func.func @transform_9(%arg0: i32) -> (i32, i32) {
    %c0_i32 = arith.constant 0 : i32
    %c0_i32_0 = arith.constant 0 : i32
    %c0_i32_1 = arith.constant 0 : i32
    return %c0_i32, %c0_i32_0 : i32, i32
  }
  func.func @transform_10(%arg0: i32) -> (i32, i32) {
    %c0_i32 = arith.constant 0 : i32
    %c0_i32_0 = arith.constant 0 : i32
    %c0_i32_1 = arith.constant 0 : i32
    return %c0_i32, %c0_i32_0 : i32, i32
  }
  func.func @transform_11(%arg0: i32) -> (i32, i32) {
    %c0_i32 = arith.constant 0 : i32
    %c0_i32_0 = arith.constant 0 : i32
    return %arg0, %c0_i32 : i32, i32
  }
}

</mosaic_0001>

<bundles_post_ra>
// kernel: mlp_forward.1
= control target key start
LH: loop header
LB: loop body
LE: loop exit
PB: predicated region body
PF: predicated region fallthrough
CT: control target
= control target key end

     0   :  { %v845_v0 = vmov 0.0   ;;  %vm846_vm0 = vmmov 0   ;;  %s1098_s1 = inlined_call_operand.vmem [shape: bf16[128,128], index: 1, kind: input, shape index: {}]   ;;  %s1099_s3 = inlined_call_operand.vmem [shape: bf16[128,128], index: 3, kind: input, shape index: {}]   ;;  %s1100_s0 = inlined_call_operand.vmem [shape: bf16[8,128], index: 0, kind: input, shape index: {}]   ;;  %s1101_s5 = inlined_call_operand.vmem [shape: bf16[128,128], index: 5, kind: input, shape index: {}]   ;;  %s1102_s2 = inlined_call_operand.vmem [shape: f32[1,128], index: 2, kind: input, shape index: {}]   ;;  %s1103_s7 = inlined_call_operand.vmem [shape: bf16[128,128], index: 7, kind: input, shape index: {}]   ;;  %s1104_s4 = inlined_call_operand.vmem [shape: f32[1,128], index: 4, kind: input, shape index: {}]   ;;  %s1105_s9 = inlined_call_operand.vmem [shape: bf16[128,128], index: 9, kind: input, shape index: {}]   ;;  %s1106_s6 = inlined_call_operand.vmem [shape: f32[1,128], index: 6, kind: input, shape index: {}]   ;;  %s1107_s8 = inlined_call_operand.vmem [shape: f32[1,128], index: 8, kind: input, shape index: {}]   ;;  %s1108_s10 = inlined_call_operand.vmem [shape: f32[1,128], index: 10, kind: input, shape index: {}]   ;;  %s1109_s11 = inlined_call_operand.vmem [shape: f32[8,128], index: 11, kind: output, shape index: {}]  }
   0x1   :  { %703 = vmatprep.subr.bf16.mxu0 %v845_v0  ;;  %v805_v1 = vld [vmem:[%s1098_s1 + $0x38] sm:$0xff]   ;;  %719 = vmatprep.mubr.msk.bf16.mxu0 %vm846_vm0, %v845_v0  ;;  %v806_v2 = vld [vmem:[%s1098_s1 + $0x30] sm:$0xff]   ;;  %v807_v3 = vld [vmem:[%s1098_s1 + $0x28] sm:$0xff]  }
   0x2   :  { %723 = vmatprep.subr.bf16.mxu1 %v845_v0  ;;  %739 = vmatprep.mubr.msk.bf16.mxu1 %vm846_vm0, %v845_v0  ;;  %v813_v4 = vld [vmem:[%s1099_s3 + $0x38] sm:$0xff]   ;;  %v808_v5 = vld [vmem:[%s1098_s1 + $0x20] sm:$0xff]   ;;  %v814_v6 = vld [vmem:[%s1099_s3 + $0x30] sm:$0xff]  }
   0x3   :  { %704 = vmatpush3.bf16.msra.mxu0 %v805_v1  ;;  %724 = vmatpush3.bf16.msra.mxu1 %v813_v4  ;;  %v809_v7 = vld [vmem:[%s1098_s1 + $0x18] sm:$0xff]   ;;  %v815_v8 = vld [vmem:[%s1099_s3 + $0x28] sm:$0xff]   ;;  %v810_v9 = vld [vmem:[%s1098_s1 + $0x10] sm:$0xff]  }
   0x4   :  { %705 = vmatprep.subr.bf16.mxu0 %v845_v0  ;;  %725 = vmatprep.subr.bf16.mxu1 %v845_v0  ;;  %v816_v10 = vld [vmem:[%s1099_s3 + $0x20] sm:$0xff]   ;;  %v811_v11 = vld [vmem:[%s1098_s1 + $0x8] sm:$0xff]   ;;  %v817_v12 = vld [vmem:[%s1099_s3 + $0x18] sm:$0xff]  }
   0x5   :  { %v812_v13 = vld [vmem:[%s1098_s1] sm:$0xff]   ;;  %v818_v14 = vld [vmem:[%s1099_s3 + $0x10] sm:$0xff]   ;;  %v819_v16 = vld [vmem:[%s1099_s3 + $0x8] sm:$0xff]  }
   0x6   :  { %v39_v15 = vld [vmem:[%s1100_s0] sm:$0xf]  ;;  %v821_v18 = vld [vmem:[%s1101_s5 + $0x38] sm:$0xff]   ;;  %v822_v19 = vld [vmem:[%s1101_s5 + $0x30] sm:$0xff]  }
   0x7   :  { %706 = vmatpush3.bf16.msra.mxu0 %v806_v2  ;;  %726 = vmatpush3.bf16.msra.mxu1 %v814_v6  ;;  %v820_v17 = vld [vmem:[%s1099_s3] sm:$0xff]   ;;  %v823_v20 = vld [vmem:[%s1101_s5 + $0x28] sm:$0xff]   ;;  %v825_v22 = vld [vmem:[%s1101_s5 + $0x18] sm:$0xff]  }
   0x8   :  { %707 = vmatprep.subr.bf16.mxu0 %v845_v0  ;;  %727 = vmatprep.subr.bf16.mxu1 %v845_v0  ;;  %v824_v21 = vld [vmem:[%s1101_s5 + $0x20] sm:$0xff]   ;;  %v826_v23 = vld [vmem:[%s1101_s5 + $0x10] sm:$0xff]   ;;  %v827_v33 = vld [vmem:[%s1101_s5 + $0x8] sm:$0xff]  }
   0x9   :  { %v613_v24 = vld [vmem:[%s1102_s2] ss:$0 sm:$0xff]  ;;  %v829_v35 = vld [vmem:[%s1103_s7 + $0x38] sm:$0xff]   ;;  %v830_v36 = vld [vmem:[%s1103_s7 + $0x30] sm:$0xff]  }
   0xa   :  { %v828_v34 = vld [vmem:[%s1101_s5] sm:$0xff]   ;;  %v831_v37 = vld [vmem:[%s1103_s7 + $0x28] sm:$0xff]   ;;  %v833_v39 = vld [vmem:[%s1103_s7 + $0x18] sm:$0xff]  }
   0xb   :  { %708 = vmatpush3.bf16.msra.mxu0 %v807_v3  ;;  %728 = vmatpush3.bf16.msra.mxu1 %v815_v8  ;;  %v832_v38 = vld [vmem:[%s1103_s7 + $0x20] sm:$0xff]   ;;  %v834_v40 = vld [vmem:[%s1103_s7 + $0x10] sm:$0xff]   ;;  %v835_v50 = vld [vmem:[%s1103_s7 + $0x8] sm:$0xff]  }
   0xc   :  { %709 = vmatprep.subr.bf16.mxu0 %v845_v0  ;;  %729 = vmatprep.subr.bf16.mxu1 %v845_v0  ;;  %v622_v41 = vld [vmem:[%s1104_s4] ss:$0 sm:$0xff]  ;;  %v837_v52 = vld [vmem:[%s1105_s9 + $0x38] sm:$0xff]   ;;  %v838_v53 = vld [vmem:[%s1105_s9 + $0x30] sm:$0xff]  }
   0xd   :  { %v836_v51 = vld [vmem:[%s1103_s7] sm:$0xff]   ;;  %v839_v54 = vld [vmem:[%s1105_s9 + $0x28] sm:$0xff]   ;;  %v841_v56 = vld [vmem:[%s1105_s9 + $0x18] sm:$0xff]  }
   0xe   :  { %v840_v55 = vld [vmem:[%s1105_s9 + $0x20] sm:$0xff]   ;;  %v842_v57 = vld [vmem:[%s1105_s9 + $0x10] sm:$0xff]   ;;  %v843_v58 = vld [vmem:[%s1105_s9 + $0x8] sm:$0xff]  }
   0xf   :  { %710 = vmatpush3.bf16.msra.mxu0 %v808_v5  ;;  %730 = vmatpush3.bf16.msra.mxu1 %v816_v10  ;;  %v631_v59 = vld [vmem:[%s1106_s6] ss:$0 sm:$0xff] }
  0x10   :  { %711 = vmatprep.subr.bf16.mxu0 %v845_v0  ;;  %731 = vmatprep.subr.bf16.mxu1 %v845_v0  ;;  %v844_v5 = vld [vmem:[%s1105_s9] sm:$0xff]  }
  0x13   :  { %712 = vmatpush3.bf16.msra.mxu0 %v809_v7  ;;  %732 = vmatpush3.bf16.msra.mxu1 %v817_v12  ;;  %v649_v12 = vld [vmem:[%s1108_s10] ss:$0 sm:$0xff] }
  0x14   :  { %713 = vmatprep.subr.bf16.mxu0 %v845_v0  ;;  %733 = vmatprep.subr.bf16.mxu1 %v845_v0 }
  0x17   :  { %714 = vmatpush3.bf16.msra.mxu0 %v810_v9  ;;  %734 = vmatpush3.bf16.msra.mxu1 %v818_v14 }
  0x18   :  { %715 = vmatprep.subr.bf16.mxu0 %v845_v0  ;;  %735 = vmatprep.subr.bf16.mxu1 %v845_v0 }
  0x1b   :  { %716 = vmatpush3.bf16.msra.mxu0 %v811_v11  ;;  %736 = vmatpush3.bf16.msra.mxu1 %v819_v16 }
  0x1c   :  { %717 = vmatprep.subr.bf16.mxu0 %v845_v0  ;;  %737 = vmatprep.subr.bf16.mxu1 %v845_v0 }
  0x1f   :  { %718 = vmatpush3.bf16.msra.mxu0 %v812_v13  ;;  %738 = vmatpush3.bf16.msra.mxu1 %v820_v17 }
  0x20   :  { %743 = vmatprep.subr.bf16.mxu0 %v845_v0  ;;  %763 = vmatprep.subr.bf16.mxu1 %v845_v0 }
  0x22   :  { %720 = vmatmul.mubr.bf16.vlgmr.msra.gmra.mxu0 %v39_v15 }
  0x23   :  { %759 = vmatprep.mubr.msk.bf16.mxu0 %vm846_vm0, %v845_v0  ;;  %744 = vmatpush3.bf16.msra.mxu0 %v821_v18 }
  0x24   :  { %745 = vmatprep.subr.bf16.mxu0 %v845_v0 }
  0x27   :  { %746 = vmatpush3.bf16.msra.mxu0 %v822_v19 }
  0x28   :  { %747 = vmatprep.subr.bf16.mxu0 %v845_v0 }
  0x2b   :  { %748 = vmatpush3.bf16.msra.mxu0 %v823_v20 }
  0x2c   :  { %749 = vmatprep.subr.bf16.mxu0 %v845_v0 }
  0x2f   :  { %750 = vmatpush3.bf16.msra.mxu0 %v824_v21 }
  0x30   :  { %751 = vmatprep.subr.bf16.mxu0 %v845_v0 }
  0x33   :  { %752 = vmatpush3.bf16.msra.mxu0 %v825_v22 }
  0x34   :  { %753 = vmatprep.subr.bf16.mxu0 %v845_v0 }
  0x37   :  { %754 = vmatpush3.bf16.msra.mxu0 %v826_v23 }
  0x38   :  { %755 = vmatprep.subr.bf16.mxu0 %v845_v0 }
  0x3b   :  { %756 = vmatpush3.bf16.msra.mxu0 %v827_v33 }
  0x3c   :  { %757 = vmatprep.subr.bf16.mxu0 %v845_v0 }
  0x3f   :  { %758 = vmatpush3.bf16.msra.mxu0 %v828_v34 }
  0x40   :  { %783 = vmatprep.subr.bf16.mxu0 %v845_v0 }
  0xe2   :  { %v145_v25 = vpop.f32.mrf.mxu0 }
  0xe3   :  { %v146_v26 = vadd.f32 %v613_v24, %v145_v25 }
  0xe4   :  { %v721_v27 = vpop.f32.mrf.mxu0 }
  0xe5   :  { %vm151_vm1 = vcmp.gt.f32.partialorder %v146_v26, 0.0  ;;  %v152_v28 = vmul.f32 0.01, %v146_v26 }
  0xe6   :  { %v148_v29 = vpop.f32.mrf.mxu0 }
  0xe7   :  { %v153_v30 = vsel %vm151_vm1, %v146_v26, %v152_v28 }
  0xe8   :  { %v722_v31 = vpop.f32.mrf.mxu0  ;;  %v154_v32 = vpack.c.bf16 %v153_v30, %v153_v30 }
  0xea   :  { %740 = vmatmul.mubr.bf16.vlgmr.msra.gmra.mxu1 %v154_v32 }
  0xeb   :  { %779 = vmatprep.mubr.msk.bf16.mxu1 %vm846_vm0, %v845_v0  ;;  %764 = vmatpush3.bf16.msra.mxu1 %v829_v35 }
  0xec   :  { %765 = vmatprep.subr.bf16.mxu1 %v845_v0 }
  0xef   :  { %766 = vmatpush3.bf16.msra.mxu1 %v830_v36 }
  0xf0   :  { %767 = vmatprep.subr.bf16.mxu1 %v845_v0 }
  0xf3   :  { %768 = vmatpush3.bf16.msra.mxu1 %v831_v37 }
  0xf4   :  { %769 = vmatprep.subr.bf16.mxu1 %v845_v0 }
  0xf7   :  { %770 = vmatpush3.bf16.msra.mxu1 %v832_v38 }
  0xf8   :  { %771 = vmatprep.subr.bf16.mxu1 %v845_v0 }
  0xfb   :  { %772 = vmatpush3.bf16.msra.mxu1 %v833_v39 }
  0xfc   :  { %773 = vmatprep.subr.bf16.mxu1 %v845_v0 }
  0xff   :  { %774 = vmatpush3.bf16.msra.mxu1 %v834_v40 }
 0x100   :  { %775 = vmatprep.subr.bf16.mxu1 %v845_v0 }
 0x103   :  { %776 = vmatpush3.bf16.msra.mxu1 %v835_v50 }
 0x104   :  { %777 = vmatprep.subr.bf16.mxu1 %v845_v0 }
 0x107   :  { %778 = vmatpush3.bf16.msra.mxu1 %v836_v51 }
 0x1aa   :  { %v260_v42 = vpop.f32.mrf.mxu1 }
 0x1ab   :  { %v261_v43 = vadd.f32 %v622_v41, %v260_v42 }
 0x1ac   :  { %v741_v44 = vpop.f32.mrf.mxu1 }
 0x1ad   :  { %vm266_vm2 = vcmp.gt.f32.partialorder %v261_v43, 0.0  ;;  %v267_v45 = vmul.f32 0.01, %v261_v43 }
 0x1ae   :  { %v263_v46 = vpop.f32.mrf.mxu1 }
 0x1af   :  { %v268_v47 = vsel %vm266_vm2, %v261_v43, %v267_v45 }
 0x1b0   :  { %v269_v48 = vpack.c.bf16 %v268_v47, %v268_v47  ;;  %v742_v49 = vpop.f32.mrf.mxu1 }
 0x1b2   :  { %760 = vmatmul.mubr.bf16.vlgmr.msra.gmra.mxu0 %v269_v48 }
 0x1b3   :  { %799 = vmatprep.mubr.msk.bf16.mxu0 %vm846_vm0, %v845_v0  ;;  %784 = vmatpush3.bf16.msra.mxu0 %v837_v52 }
 0x1b4   :  { %785 = vmatprep.subr.bf16.mxu0 %v845_v0 }
 0x1b7   :  { %786 = vmatpush3.bf16.msra.mxu0 %v838_v53 }
 0x1b8   :  { %787 = vmatprep.subr.bf16.mxu0 %v845_v0 }
 0x1bb   :  { %788 = vmatpush3.bf16.msra.mxu0 %v839_v54 }
 0x1bc   :  { %789 = vmatprep.subr.bf16.mxu0 %v845_v0 }
 0x1bf   :  { %790 = vmatpush3.bf16.msra.mxu0 %v840_v55 }
 0x1c0   :  { %791 = vmatprep.subr.bf16.mxu0 %v845_v0 }
 0x1c3   :  { %792 = vmatpush3.bf16.msra.mxu0 %v841_v56 }
 0x1c4   :  { %793 = vmatprep.subr.bf16.mxu0 %v845_v0 }
 0x1c7   :  { %794 = vmatpush3.bf16.msra.mxu0 %v842_v57 }
 0x1c8   :  { %795 = vmatprep.subr.bf16.mxu0 %v845_v0 }
 0x1cb   :  { %796 = vmatpush3.bf16.msra.mxu0 %v843_v58 }
 0x1cc   :  { %797 = vmatprep.subr.bf16.mxu0 %v845_v0  ;;  %v640_v0 = vld [vmem:[%s1107_s8] ss:$0 sm:$0xff] }
 0x1cf   :  { %798 = vmatpush3.bf16.msra.mxu0 %v844_v5 }
 0x272   :  { %v375_v60 = vpop.f32.mrf.mxu0 }
 0x273   :  { %v376_v61 = vadd.f32 %v631_v59, %v375_v60 }
 0x274   :  { %v761_v62 = vpop.f32.mrf.mxu0 }
 0x275   :  { %vm381_vm3 = vcmp.gt.f32.partialorder %v376_v61, 0.0  ;;  %v382_v63 = vmul.f32 0.01, %v376_v61 }
 0x276   :  { %v378_v1 = vpop.f32.mrf.mxu0 }
 0x277   :  { %v383_v2 = vsel %vm381_vm3, %v376_v61, %v382_v63 }
 0x278   :  { %v384_v3 = vpack.c.bf16 %v383_v2, %v383_v2  ;;  %v762_v4 = vpop.f32.mrf.mxu0 }
 0x27a   :  { %780 = vmatmul.mubr.bf16.vlgmr.msra.gmra.mxu1 %v384_v3 }
 0x33a   :  { %v490_v6 = vpop.f32.mrf.mxu1 }
 0x33b   :  { %v491_v7 = vadd.f32 %v640_v0, %v490_v6 }
 0x33c   :  { %v781_v8 = vpop.f32.mrf.mxu1 }
 0x33d   :  { %v496_v9 = vpack.c.bf16 %v491_v7, %v491_v7 }
 0x33e   :  { %v493_v10 = vpop.f32.mrf.mxu1 }
 0x33f   :  { %800 = vmatmul.mubr.bf16.vlgmr.msra.gmra.mxu0 %v496_v9 }
 0x340   :  { %v782_v11 = vpop.f32.mrf.mxu1 }
 0x3ff   :  { %v602_v13 = vpop.f32.mrf.mxu0 }
 0x400   :  { %v603_v14 = vadd.f32 %v649_v12, %v602_v13 }
 0x401   :  { %v801_v15 = vpop.f32.mrf.mxu0 }
 0x402   :  { %608 = vst [vmem:[%s1109_s11] sm:$0xff] %v603_v14 }
 0x403   :  { %v605_v16 = vpop.f32.mrf.mxu0 }
 0x405   :  { %v802_v17 = vpop.f32.mrf.mxu0 }

</bundles_post_ra>
